<compile_context>
chip_gen: v7x
topology: tpu7x:2x2x1
jax: 0.10.0
libtpu: 0.0.40
codegen_flags: <defaults>
</compile_context>

<pallas_src>
import jax
import jax.numpy as jnp
import numpy as np
from jax.experimental import pallas as pl
from jax.experimental.pallas import tpu as pltpu


def _round_up(x, m):
    return (x + m - 1) // m * m


def _choose_row_blocking(B, T):
    """Pick (Bb, B_pad): batch rows folded per grid step and the padded batch size."""
    total_rows = B * T
    target_rows = 512                       # large MXU-friendly M; amortizes ~0.35us/step
    bb = max(1, target_rows // max(T, 1))
    # v7x has two TensorCores: keep >= 2 'parallel' row blocks when there is enough work.
    if total_rows >= 512:
        bb = min(bb, _round_up((B + 1) // 2, 8))
    if bb >= B:
        return B, B                         # single grid step: block == full array dims
    Bb = _round_up(bb, 8)                   # sublane divisibility when actually tiling
    if Bb >= B:
        return B, B
    return Bb, _round_up(B, Bb)


def _encoder_avg_kernel(tok_ref,            # SMEM (B_pad*T,) int32 — scalar prefetch
                        tab_hbm,            # HBM  (V, E)  f32     — memory_space=pl.ANY
                        w_ref,              # VMEM (E, Hpad)       — matmul dtype
                        b_ref,              # VMEM (1, Hpad) f32
                        hid_ref,            # out  (Rb, Hpad) f32
                        last_ref,           # out  (Bb, Hpad) f32
                        emb_buf,            # scratch VMEM (Rb, E) f32
                        gather_sem):        # scratch DMA sems (Rb,)
    i = pl.program_id(0)
    rb = emb_buf.shape[0]
    base = i * rb

    # --- Embedding row gather: emb_buf[r] <- table[tok[base + r]]  (HBM -> VMEM DMA) ---
    # Assumes 0 <= token id < vocab_size (PyTorch nn.Embedding would raise on OOB ids).
    # TODO(synk): double-buffer the gather across grid steps (prefetch block i+1's rows
    # while computing block i) once shapes are large enough for the DMA to be exposed.
    @pl.loop(0, rb)
    def _start(r):
        tid = tok_ref[base + r]
        pltpu.make_async_copy(tab_hbm.at[tid], emb_buf.at[r], gather_sem.at[r]).start()

    @pl.loop(0, rb)
    def _wait(r):
        pltpu.make_async_copy(tab_hbm.at[0], emb_buf.at[r], gather_sem.at[r]).wait()

    # --- Projection (nn.Linear) + 'linear' activation (identity) ------------------------
    emb = emb_buf[...].astype(w_ref.dtype)                       # single cast, (Rb, E)
    out = jnp.dot(emb, w_ref[...],
                  preferred_element_type=jnp.float32) + b_ref[...]   # (Rb, Hpad) f32

    # data.hidden — lane-dense store (Hpad multiple of 128 -> unmasked vst).
    hid_ref[...] = out

    # data.last_hidden — unmasked mean over T: reshape + sublane-sum on the XLU slot
    # (no averaging-matrix matmul, no extra input DMA).
    bb = last_ref.shape[0]
    t = rb // bb
    last_ref[...] = jnp.sum(out.reshape(bb, t, out.shape[-1]), axis=1) * (1.0 / t)


def encoder_average_forward(seq, lengths, embed_table, proj_w, proj_b, *,
                            matmul_dtype=jnp.bfloat16):
    """seq: (B, T) int32; returns (hidden (B, T, H), last_hidden (B, H))."""
    del lengths  # not used in the forward compute (mean is unmasked), matching PyTorch.
    B, T = seq.shape
    V, E = embed_table.shape
    H = proj_w.shape[1]
    Hpad = _round_up(H, 128)                # lane-dense output width

    Bb, B_pad = _choose_row_blocking(B, T)
    num_blocks = B_pad // Bb
    Rb = Bb * T                             # token rows per grid step

    # ---- prepare / pad inputs --------------------------------------------------------
    tok = seq.astype(jnp.int32).reshape(B * T)
    if B_pad != B:
        tok = jnp.concatenate([tok, jnp.zeros(((B_pad - B) * T,), jnp.int32)])

    tab = embed_table.astype(jnp.float32)   # stays in HBM; rows gathered by DMA
    w_pad = jnp.zeros((E, Hpad), matmul_dtype).at[:, :H].set(
        proj_w.astype(matmul_dtype))                                # (E, Hpad)
    b_pad = jnp.zeros((1, Hpad), jnp.float32).at[:, :H].set(
        proj_b.astype(jnp.float32)[None, :])                        # (1, Hpad)

    # ---- explicit VMEM budget (table is HBM-resident, so this is just tiles + weights)
    mm_bytes = jnp.dtype(matmul_dtype).itemsize
    vmem_need = (
        2 * E * Hpad * mm_bytes             # projection weight (double-buffered default)
        + 2 * Hpad * 4                      # bias
        + Rb * E * 4                        # embedding gather scratch
        + 2 * Rb * Hpad * 4                 # hidden out (double-buffered)
        + 2 * Bb * Hpad * 4                 # last_hidden out (double-buffered)
    )
    vmem_limit = int(min(48 << 20, max(32 << 20, 2 * vmem_need + (4 << 20))))

    grid_spec = pltpu.PrefetchScalarGridSpec(
        num_scalar_prefetch=1,              # token ids -> SMEM, read inside the kernel
        grid=(num_blocks,),
        in_specs=[
            pl.BlockSpec(memory_space=pl.ANY),                 # embedding table (HBM)
            pl.BlockSpec((E, Hpad), lambda i, ids: (0, 0)),    # projection weight
            pl.BlockSpec((1, Hpad), lambda i, ids: (0, 0)),    # projection bias
        ],
        out_specs=[
            pl.BlockSpec((Rb, Hpad), lambda i, ids: (i, 0)),   # hidden (lane-dense slab)
            pl.BlockSpec((Bb, Hpad), lambda i, ids: (i, 0)),   # last_hidden (lane-dense)
        ],
        scratch_shapes=[
            pltpu.VMEM((Rb, E), jnp.float32),                  # gathered embedding rows
            pltpu.SemaphoreType.DMA((Rb,)),                    # one sem per gathered row
        ],
    )

    hid2d, last2d = pl.pallas_call(
        _encoder_avg_kernel,
        grid_spec=grid_spec,
        out_shape=(
            jax.ShapeDtypeStruct((B_pad * T, Hpad), jnp.float32),
            jax.ShapeDtypeStruct((B_pad, Hpad), jnp.float32),
        ),
        compiler_params=pltpu.CompilerParams(
            # Row-block axis stays parallel so v7x's two TensorCores shard it.
            dimension_semantics=("parallel",),
            vmem_limit_bytes=vmem_limit,
        ),
    )(tok, tab, w_pad, b_pad)

    hidden = hid2d[: B * T, :H].reshape(B, T, H)
    last_hidden = last2d[:B, :H]
    return hidden, last_hidden


if __name__ == "__main__":
    # Small, deterministic setup consistent with the module's __init__.
    vocab_size, embed_size, hidden_size = 64, 32, 32
    B, T = 2, 8

    key = jax.random.PRNGKey(0)
    k_emb, k_w, k_b, k_seq = jax.random.split(key, 4)

    embed_table = jax.random.normal(k_emb, (vocab_size, embed_size), dtype=jnp.float32)
    embed_table = embed_table.at[0, :].set(0.0)           # padding_idx=0
    # nn.Linear(embed_size, hidden_size): store transposed weight (E, H) for x @ W.
    proj_w = jax.random.normal(k_w, (embed_size, hidden_size), dtype=jnp.float32) * 0.1
    proj_b = jax.random.normal(k_b, (hidden_size,), dtype=jnp.float32) * 0.1

    seq = jax.random.randint(k_seq, (B, T), 0, vocab_size, dtype=jnp.int32)
    seq = seq.at[:, -1].set(0)                            # include some padding tokens
    lengths = jnp.full((B,), T - 1, dtype=jnp.int32)

    # Pure-JAX reference (matches the PyTorch forward: unmasked mean over T).
    emb_ref = jnp.take(embed_table, seq, axis=0)                      # (B, T, E)
    out_ref = emb_ref @ proj_w + proj_b                               # (B, T, H)
    last_ref = out_ref.mean(axis=1)                                   # (B, H)

    # Default fast path: bf16 MXU operands, f32 accumulation.
    hidden, last_hidden = encoder_average_forward(seq, lengths, embed_table, proj_w, proj_b)
    jax.block_until_ready((hidden, last_hidden))
    assert np.allclose(np.asarray(hidden), np.asarray(out_ref), atol=5e-2, rtol=5e-2)
    assert np.allclose(np.asarray(last_hidden), np.asarray(last_ref), atol=5e-2, rtol=5e-2)

    # Parity path: f32 MXU operands (matches PyTorch numerics closely).
    hidden_f32, last_f32 = encoder_average_forward(
        seq, lengths, embed_table, proj_w, proj_b, matmul_dtype=jnp.float32)
    jax.block_until_ready((hidden_f32, last_f32))
    assert np.allclose(np.asarray(hidden_f32), np.asarray(out_ref), atol=1e-3, rtol=1e-3)
    assert np.allclose(np.asarray(last_f32), np.asarray(last_ref), atol=1e-3, rtol=1e-3)

    print("KERNEL_OK")
</pallas_src>

<mosaic_0001>
module attributes {stable_mosaic.version = 11 : i64} {
  func.func @_encoder_avg_kernel(%arg0: i32, %arg1: memref<16xi32, #tpu.memory_space<smem>>, %arg2: memref<64x32xf32, #tpu.memory_space<any>>, %arg3: memref<32x128xbf16, #tpu.memory_space<vmem>>, %arg4: memref<1x128xf32, #tpu.memory_space<vmem>>, %arg5: memref<16x128xf32, #tpu.memory_space<vmem>>, %arg6: memref<2x128xf32, #tpu.memory_space<vmem>>, %arg7: memref<16x32xf32, #tpu.memory_space<vmem>>, %arg8: memref<16x!tpu.dma_semaphore, #tpu.memory_space<semaphore_mem>>) attributes {dimension_semantics = [#tpu.dimension_semantics<parallel>], iteration_bounds = array<i64: 1>, scalar_prefetch = 1 : i64, scratch_operands = 2 : i64, tpu.core_type = #tpu.core_type<tc>, window_params = [{}, {pipeline_mode = #tpu.pipeline_mode<synchronous>, transform_indices = @transform_1, window_bounds = array<i64: 32, 128>}, {pipeline_mode = #tpu.pipeline_mode<synchronous>, transform_indices = @transform_2, window_bounds = array<i64: 1, 128>}, {transform_indices = @transform_3, window_bounds = array<i64: 16, 128>}, {transform_indices = @transform_4, window_bounds = array<i64: 2, 128>}]} {
    %c16_i32 = arith.constant 16 : i32
    %0 = arith.muli %arg0, %c16_i32 : i32
    %c0_i32 = arith.constant 0 : i32
    %c16_i32_0 = arith.constant 16 : i32
    %1 = arith.addi %c0_i32, %c16_i32_0 : i32
    %c1_i32 = arith.constant 1 : i32
    scf.for %arg9 = %c0_i32 to %1 step %c1_i32  : i32 {
      %c1_i32_17 = arith.constant 1 : i32
      %16 = arith.muli %arg9, %c1_i32_17 : i32
      %c0_i32_18 = arith.constant 0 : i32
      %17 = arith.addi %c0_i32_18, %16 : i32
      %18 = arith.addi %0, %17 : i32
      %19 = arith.index_cast %18 : i32 to index
      %20 = memref.load %arg1[%19] : memref<16xi32, #tpu.memory_space<smem>>
      %c0_i32_19 = arith.constant 0 : i32
      %21 = tpu.memref_slice %arg2[%20, %c0_i32_19] : memref<64x32xf32, #tpu.memory_space<any>> -> memref<1x32xf32, #tpu.memory_space<any>>
      %22 = tpu.memref_squeeze %21 : memref<1x32xf32, #tpu.memory_space<any>> -> memref<32xf32, #tpu.memory_space<any>>
      %c0_i32_20 = arith.constant 0 : i32
      %23 = tpu.memref_slice %arg7[%17, %c0_i32_20] : memref<16x32xf32, #tpu.memory_space<vmem>> -> memref<1x32xf32, #tpu.memory_space<vmem>>
      %24 = tpu.memref_squeeze %23 : memref<1x32xf32, #tpu.memory_space<vmem>> -> memref<32xf32, #tpu.memory_space<vmem>>
      %25 = tpu.memref_slice %arg8[%17] : memref<16x!tpu.dma_semaphore, #tpu.memory_space<semaphore_mem>> -> memref<1x!tpu.dma_semaphore, #tpu.memory_space<semaphore_mem>>
      %26 = tpu.memref_squeeze %25 : memref<1x!tpu.dma_semaphore, #tpu.memory_space<semaphore_mem>> -> memref<!tpu.dma_semaphore, #tpu.memory_space<semaphore_mem>>
      tpu.enqueue_dma source(%22 : memref<32xf32, #tpu.memory_space<any>>) target(%24 : memref<32xf32, #tpu.memory_space<vmem>>) target_semaphore(%26 : memref<!tpu.dma_semaphore, #tpu.memory_space<semaphore_mem>>)
    }
    %c16_i32_1 = arith.constant 16 : i32
    %c0_i32_2 = arith.constant 0 : i32
    %c16_i32_3 = arith.constant 16 : i32
    %2 = arith.addi %c0_i32_2, %c16_i32_3 : i32
    %c1_i32_4 = arith.constant 1 : i32
    scf.for %arg9 = %c0_i32_2 to %2 step %c1_i32_4  : i32 {
      %c1_i32_17 = arith.constant 1 : i32
      %16 = arith.muli %arg9, %c1_i32_17 : i32
      %c0_i32_18 = arith.constant 0 : i32
      %17 = arith.addi %c0_i32_18, %16 : i32
      %c0_i32_19 = arith.constant 0 : i32
      %c0_i32_20 = arith.constant 0 : i32
      %18 = tpu.memref_slice %arg2[%c0_i32_19, %c0_i32_20] : memref<64x32xf32, #tpu.memory_space<any>> -> memref<1x32xf32, #tpu.memory_space<any>>
      %19 = tpu.memref_squeeze %18 : memref<1x32xf32, #tpu.memory_space<any>> -> memref<32xf32, #tpu.memory_space<any>>
      %c0_i32_21 = arith.constant 0 : i32
      %20 = tpu.memref_slice %arg7[%17, %c0_i32_21] : memref<16x32xf32, #tpu.memory_space<vmem>> -> memref<1x32xf32, #tpu.memory_space<vmem>>
      %21 = tpu.memref_squeeze %20 : memref<1x32xf32, #tpu.memory_space<vmem>> -> memref<32xf32, #tpu.memory_space<vmem>>
      %22 = tpu.memref_slice %arg8[%17] : memref<16x!tpu.dma_semaphore, #tpu.memory_space<semaphore_mem>> -> memref<1x!tpu.dma_semaphore, #tpu.memory_space<semaphore_mem>>
      %23 = tpu.memref_squeeze %22 : memref<1x!tpu.dma_semaphore, #tpu.memory_space<semaphore_mem>> -> memref<!tpu.dma_semaphore, #tpu.memory_space<semaphore_mem>>
      tpu.wait_dma2 semaphore(%23 : memref<!tpu.dma_semaphore, #tpu.memory_space<semaphore_mem>>) src(%19 : memref<32xf32, #tpu.memory_space<any>>) dst(%21 : memref<32xf32, #tpu.memory_space<vmem>>)
    }
    %c16_i32_5 = arith.constant 16 : i32
    %c0 = arith.constant 0 : index
    %c0_6 = arith.constant 0 : index
    %3 = vector.load %arg7[%c0, %c0_6] : memref<16x32xf32, #tpu.memory_space<vmem>>, vector<16x32xf32>
    %4 = arith.truncf %3 : vector<16x32xf32> to vector<16x32xbf16>
    %c0_7 = arith.constant 0 : index
    %c0_8 = arith.constant 0 : index
    %5 = vector.load %arg3[%c0_7, %c0_8] : memref<32x128xbf16, #tpu.memory_space<vmem>>, vector<32x128xbf16>
    %cst = arith.constant dense<0.000000e+00> : vector<16x128xf32>
    %6 = tpu.matmul %4, %5, %cst {dimension_numbers = #tpu.dot_dimension_numbers<[1], [0], [0], [1], [0, 0, 1, 1], [], []>} : vector<16x32xbf16>, vector<32x128xbf16>, vector<16x128xf32> -> vector<16x128xf32>
    %c0_9 = arith.constant 0 : index
    %c0_10 = arith.constant 0 : index
    %7 = vector.load %arg4[%c0_9, %c0_10] : memref<1x128xf32, #tpu.memory_space<vmem>>, vector<1x128xf32>
    %8 = vector.broadcast %7 : vector<1x128xf32> to vector<16x128xf32>
    %9 = arith.addf %6, %8 : vector<16x128xf32>
    %c0_11 = arith.constant 0 : index
    %c0_12 = arith.constant 0 : index
    %10 = vector.load %arg5[%c0_11, %c0_12] : memref<16x128xf32, #tpu.memory_space<vmem>>, vector<16x128xf32>
    tpu.vector_store %arg5[%c0_11, %c0_12], %9 {strides = array<i32>} : memref<16x128xf32, #tpu.memory_space<vmem>>, vector<16x128xf32>,
    %11 = vector.shape_cast %9 : vector<16x128xf32> to vector<2x8x128xf32>
    %cst_13 = arith.constant dense<0.000000e+00> : vector<2x128xf32>
    %12 = vector.multi_reduction <add>, %11, %cst_13 [1] : vector<2x8x128xf32> to vector<2x128xf32>
    %cst_14 = arith.constant 1.250000e-01 : f32
    %13 = vector.broadcast %cst_14 : f32 to vector<2x128xf32>
    %14 = arith.mulf %12, %13 : vector<2x128xf32>
    %c0_15 = arith.constant 0 : index
    %c0_16 = arith.constant 0 : index
    %15 = vector.load %arg6[%c0_15, %c0_16] : memref<2x128xf32, #tpu.memory_space<vmem>>, vector<2x128xf32>
    tpu.vector_store %arg6[%c0_15, %c0_16], %14 {strides = array<i32>} : memref<2x128xf32, #tpu.memory_space<vmem>>, vector<2x128xf32>,
    return
  }
  func.func @transform_1(%arg0: i32, %arg1: memref<16xi32, #tpu.memory_space<smem>>) -> (i32, i32) {
    %c0_i32 = arith.constant 0 : i32
    %c0_i32_0 = arith.constant 0 : i32
    %c0_i32_1 = arith.constant 0 : i32
    return %c0_i32, %c0_i32_0 : i32, i32
  }
  func.func @transform_2(%arg0: i32, %arg1: memref<16xi32, #tpu.memory_space<smem>>) -> (i32, i32) {
    %c0_i32 = arith.constant 0 : i32
    %c0_i32_0 = arith.constant 0 : i32
    %c0_i32_1 = arith.constant 0 : i32
    return %c0_i32, %c0_i32_0 : i32, i32
  }
  func.func @transform_3(%arg0: i32, %arg1: memref<16xi32, #tpu.memory_space<smem>>) -> (i32, i32) {
    %c0_i32 = arith.constant 0 : i32
    %c0_i32_0 = arith.constant 0 : i32
    return %arg0, %c0_i32 : i32, i32
  }
  func.func @transform_4(%arg0: i32, %arg1: memref<16xi32, #tpu.memory_space<smem>>) -> (i32, i32) {
    %c0_i32 = arith.constant 0 : i32
    %c0_i32_0 = arith.constant 0 : i32
    return %arg0, %c0_i32 : i32, i32
  }
}

</mosaic_0001>

<bundles_post_ra>
// kernel: tpu_custom_call.1
= control target key start
LH: loop header
LB: loop body
LE: loop exit
PB: predicated region body
PF: predicated region fallthrough
CT: control target
= control target key end

     0   :  { %s559_s0 = inlined_call_operand.vmem [shape: s32[16], index: 0, kind: input, shape index: {}]   ;;  %s560_s1 = inlined_call_operand.vmem [shape: f32[64,32], index: 1, kind: input, shape index: {}]   ;;  %s561_s2 = inlined_call_operand.vmem [shape: bf16[32,128], index: 2, kind: input, shape index: {}]   ;;  %s562_s3 = inlined_call_operand.vmem [shape: f32[1,128], index: 3, kind: input, shape index: {}]   ;;  %s563_s4 = inlined_call_operand.hbm [shape: f32[16,128], index: 4, kind: output, shape index: {0}]   ;;  %s564_s5 = inlined_call_operand.hbm [shape: f32[2,128], index: 5, kind: output, shape index: {1}]  }
   0x1   :  { %s11_s20 = sshll.u32 %s559_s0, 4  ;;  %s12_s20 = int_to_ptr.vmem [resolvable:$true] %s11_s20 }
   0x2   :  { %s403_s21 = scalar_lea.vmem %s12_s20, 16  ;;  %p408_p1 = scmp.lt.s32.totalorder %s12_s20, %s12_s20 }
   0x3   :  { %p404_p0 = scmp.ne.s32.totalorder %s12_s20, %s403_s21  ;;  %p409_p2 = scmp.lt.s32.totalorder %s403_s21, %s403_s21 }
   0x5   :  { %p410_p3 = por %p409_p2, %p408_p1 }
   0x7   :  { %p411_p4 = pnand %p410_p3, %p404_p0 }
   0x9   :  { %414 = shalt.err (!%p411_p4)  }
   0xa   :  { %s483_s22 = smov [#allocation5]  }
   0xb   :  { %14 = dma.vmem_to_smem %s12_s20, 16, %s483_s22, [#allocation4] }
   0xc   :  { %467 = dma.done.wait [#allocation4], 16 }
   0xd   :  { %468 = vsyncadd [#allocation4], 4294967280 }
   0xe   :  { %16 = sfence }
   0xf   :  { %17 = vsyncpa [#allocation7], 0 }
  0x10   :  { %18 = vsyncpa [#allocation9], 0  ;;  %s475_s23 = smov 0  }
  0x11 LB: > { %s32_s0 = sld [smem:[#allocation5 + %s477_s23]]  ;;  %s34_s27 = scalar_lea.vmem [#allocation2], %s477_s23  ;;  %s477_s23 = sphi %s475_s23, %s30_s23  }
  0x12   : > { %s35_s28 = scalar_lea.sflag [#allocation3], %s477_s23 }
  0x17   : > { %s33_s26 = scalar_lea.vmem %s560_s1, %s32_s0 }
  0x18   : > { %v53_v0 = vld [vmem:[%s33_s26] sm:$0x1] }
  0x19   : > { %54 = vst [vmem:[%s34_s27] sm:$0x1] %v53_v0 }
  0x1a   : > { %79 = vsyncadd %s35_s28, 16  ;;  %s30_s23 = sadd.s32 1, %s477_s23  }
  0x1b   : > { %p27_p5 = scmp.ge.s32.totalorder %s30_s23, 16  }
  0x1c   :  { %s479_s29 = smov (%p27_p5), 0  }
  0x1d   :  { %29 = sbr.rel (!%p27_p5) target bundleno = 17 (0x11), region = 109 }
  0x24 LB: > { %s86_s30 = scalar_lea.sflag [#allocation3], %s481_s29  ;;  %s481_s29 = sphi %s479_s29, %s85_s29  }
  0x25   : > { %469 = dma.done.wait %s86_s30, 16 }
  0x26   : > { %470 = vsyncadd %s86_s30, 4294967280  ;;  %s85_s29 = sadd.s32 1, %s481_s29  }
  0x27   : > { %p82_p6 = scmp.ge.s32.totalorder %s85_s29, 16  }
  0x28   :  { %v401_v1 = vld [vmem:[%s561_s2] sm:$0xff] (%p82_p6)   ;;  %v484_v2 = vmov (%p82_p6), 0.0   ;;  %v402_v3 = vld [vmem:[%s561_s2 + $0x8] sm:$0xff] (%p82_p6)   ;;  %vm485_vm0 = vmmov (%p82_p6), 0   ;;  %vm115_vm1 = vcmask (%p82_p6), 261120   ;;  %s486_s11 = smov (%p82_p6), [#allocation6]  }
  0x29   :  { %84 = sbr.rel (!%p82_p6) target bundleno = 36 (0x24), region = 120  ;;  %370 = vmatprep.subr.bf16.mxu0 (%p82_p6), %v484_v2  ;;  %374 = vmatprep.mubr.msk.bf16.mxu0 (%p82_p6), %vm485_vm0, %v484_v2  ;;  %v89_v4 = vld [vmem:[#allocation2] sm:$0xff] (%p82_p6)  ;;  %v90_v5 = vld [vmem:[#allocation2 + $0x8] sm:$0xff] (%p82_p6)  ;;  %s187_s12 = sshll.u32 (%p82_p6), %s486_s11, 4  ;;  %s188_s12 = int_to_ptr.vmem [resolvable:$true] %s187_s12 }
  0x2a   :  { %371 = vmatpush3.bf16.msra.mxu0 (%p82_p6), %v401_v1  ;;  %v91_v6 = vpack.c.bf16 (%p82_p6), %v90_v5, %v89_v4  ;;  %v347_v7 = vld [vmem:[%s562_s3] ss:$0 sm:$0xff] (%p82_p6)  ;;  %s415_s2 = scalar_lea.vmem (%p82_p6), %s188_s12, 256  ;;  %p420_p8 = scmp.lt.s32.totalorder (%p82_p6), %s188_s12, %s188_s12 }
  0x2b   :  { %372 = vmatprep.subr.bf16.mxu0 (%p82_p6), %v484_v2  ;;  %p416_p7 = scmp.ne.s32.totalorder (%p82_p6), %s188_s12, %s415_s2  ;;  %p421_p9 = scmp.lt.s32.totalorder (%p82_p6), %s415_s2, %s415_s2 }
  0x2d   :  { %p422_p10 = por (%p82_p6), %p421_p9, %p420_p8 }
  0x2e   :  { %373 = vmatpush3.bf16.msra.mxu0 (%p82_p6), %v402_v3 }
  0x2f   :  { %p423_p11 = pnand (%p82_p6), %p422_p10, %p416_p7 }
  0x31   :  { %375 = vmatmul.mubr.msk.bf16.vlgmr.msra.gmra.mrb[0].mxu0 %vm115_vm1, %v91_v6 }
 0x104   :  { %v153_v8 = vpop.f32.mrb[0].mxu0 }
 0x105   :  { %v154_v9 = vadd.f32 %v347_v7, %v153_v8  ;;  %v376_v10 = vpop.f32.mrb[1].mxu0 }
 0x106   :  { %v156_v11 = vpop.f32.mrb[2].mxu0 }
 0x107   :  { %160 = vst [vmem:[#allocation6] sm:$0xff] %v154_v9  ;;  %v162_v12 = vrot.slane %v154_v9, 4  ;;  %v157_v13 = vadd.f32 %v347_v7, %v156_v11  ;;  %v377_v14 = vpop.f32.mrb[3].mxu0 }
 0x109   :  { %v163_v15 = vadd.f32 %v162_v12, %v154_v9  ;;  %161 = vst [vmem:[#allocation6 + $0x8] sm:$0xff] %v157_v13  ;;  %v168_v16 = vrot.slane %v157_v13, 4 }
 0x10a   :  { %426 = shalt.err (!%p423_p11)
}
 0x10b   :  { %s427_s14 = scalar_lea.hbm %s563_s4, 256 }
 0x10c   :  { %p428_p12 = scmp.ne.s32.totalorder %s563_s4, %s427_s14  ;;  %p431_p13 = scmp.lt.u32.totalorder %s427_s14, %s563_s4 }
 0x10e   :  { %p433_p0 = pnand %p431_p13, %p428_p12 }
 0x110   :  { %436 = shalt.err (!%p433_p0)
}
 0x111   :  { %s487_s19 = smov 128   ;;  %s488_s20 = smov 8   ;;  %v164_v17 = vrot.slane %v163_v15, 2  ;;  %v169_v18 = vadd.f32 %v168_v16, %v157_v13  ;;  %vm178_vm2 = vcmask 1041409  }
 0x112   :  { %193 = dma.vmem_to_hbm [thread:$0]  %s188_s12, 256, %s563_s4, [#allocation7], %s487_s19, %s487_s19, %s488_s20  }
 0x113   :  { %v165_v19 = vadd.f32 %v164_v17, %v163_v15  ;;  %v170_v20 = vrot.slane %v169_v18, 2  ;;  %s489_s23 = smov [#allocation8]  }
 0x114   :  { %s200_s0 = sshll.u32 %s489_s23, 4  ;;  %s201_s0 = int_to_ptr.vmem [resolvable:$true] %s200_s0 }
 0x115   :  { %v171_v21 = vadd.f32 %v170_v20, %v169_v18  ;;  %v166_v22 = vrot.slane %v165_v19, 1  ;;  %s437_s24 = scalar_lea.vmem %s201_s0, 32  ;;  %p442_p2 = scmp.lt.s32.totalorder %s201_s0, %s201_s0 }
 0x116   :  { %p438_p1 = scmp.ne.s32.totalorder %s201_s0, %s437_s24  ;;  %p443_p3 = scmp.lt.s32.totalorder %s437_s24, %s437_s24 }
 0x117   :  { %v167_v23 = vadd.f32 %v166_v22, %v165_v19  ;;  %v172_v24 = vrot.slane %v171_v21, 1 }
 0x118   :  { %p444_p4 = por %p443_p3, %p442_p2 }
 0x119   :  { %v173_v25 = vadd.f32 %v172_v24, %v171_v21  ;;  %v174_v26 = vmul.f32 0.125, %v167_v23 }
 0x11a   :  { %p445_p5 = pnand %p444_p4, %p438_p1 }
 0x11b   :  { %v175_v27 = vmul.f32 0.125, %v173_v25 }
 0x11d   :  { %v179_v28 = vsel %vm178_vm2, %v175_v27, %v174_v26 }
 0x11e   :  { %181 = vst [vmem:[#allocation8] sm:$0x3] %v179_v28 }
 0x11f   :  { %448 = shalt.err (!%p445_p5)
}
 0x120   :  { %s449_s26 = scalar_lea.hbm %s564_s5, 32 }
 0x121   :  { %p450_p6 = scmp.ne.s32.totalorder %s564_s5, %s449_s26  ;;  %p453_p7 = scmp.lt.u32.totalorder %s449_s26, %s564_s5 }
 0x123   :  { %p455_p8 = pnand %p453_p7, %p450_p6 }
 0x125   :  { %458 = shalt.err (!%p455_p8)
}
 0x126   :  { %203 = dma.vmem_to_hbm [thread:$0]  %s201_s0, 32, %s564_s5, [#allocation9]  }
 0x127   :  { %471 = dma.done.wait [#allocation7], 256  }
 0x128   :  { %472 = vsyncadd [#allocation7], 4294967040 }
 0x129   :  { %473 = dma.done.wait [#allocation9], 32  }
 0x12a   :  { %474 = vsyncadd [#allocation9], 4294967264 }
 0x12b   :  { %210 = vsyncpa [#allocation7], 1 }
 0x12c   :  { %211 = vsyncpa [#allocation9], 1 }
 0x12d   :  { %212 = vsyncmov [#allocation3] }
 0x130   :  { %s213_s8 = vpop.sfrf %212 }
 0x131   :  { %p351_p9 = scmp.ne.s32.totalorder %s213_s8, 0 }
 0x133   :  { %217 = shalt.err (%p351_p9)  }
 0x134   :  { %219 = vsyncmov [#allocation3 + $0x1] }
 0x137   :  { %s220_s9 = vpop.sfrf %219 }
 0x138   :  { %p352_p10 = scmp.ne.s32.totalorder %s220_s9, 0 }
 0x13a   :  { %224 = shalt.err (%p352_p10)  }
 0x13b   :  { %226 = vsyncmov [#allocation3 + $0x2] }
 0x13e   :  { %s227_s1 = vpop.sfrf %226 }
 0x13f   :  { %p353_p11 = scmp.ne.s32.totalorder %s227_s1, 0 }
 0x141   :  { %231 = shalt.err (%p353_p11)  }
 0x142   :  { %233 = vsyncmov [#allocation3 + $0x3] }
 0x145   :  { %s234_s5 = vpop.sfrf %233 }
 0x146   :  { %p354_p12 = scmp.ne.s32.totalorder %s234_s5, 0 }
 0x148   :  { %238 = shalt.err (%p354_p12)  }
 0x149   :  { %240 = vsyncmov [#allocation3 + $0x4] }
 0x14c   :  { %s241_s10 = vpop.sfrf %240 }
 0x14d   :  { %p355_p13 = scmp.ne.s32.totalorder %s241_s10, 0 }
 0x14f   :  { %245 = shalt.err (%p355_p13)  }
 0x150   :  { %247 = vsyncmov [#allocation3 + $0x5] }
 0x153   :  { %s248_s11 = vpop.sfrf %247 }
 0x154   :  { %p356_p0 = scmp.ne.s32.totalorder %s248_s11, 0 }
 0x156   :  { %252 = shalt.err (%p356_p0)  }
 0x157   :  { %254 = vsyncmov [#allocation3 + $0x6] }
 0x15a   :  { %s255_s12 = vpop.sfrf %254 }
 0x15b   :  { %p357_p1 = scmp.ne.s32.totalorder %s255_s12, 0 }
 0x15d   :  { %259 = shalt.err (%p357_p1)  }
 0x15e   :  { %261 = vsyncmov [#allocation3 + $0x7] }
 0x161   :  { %s262_s2 = vpop.sfrf %261 }
 0x162   :  { %p358_p2 = scmp.ne.s32.totalorder %s262_s2, 0 }
 0x164   :  { %266 = shalt.err (%p358_p2)  }
 0x165   :  { %268 = vsyncmov [#allocation3 + $0x8] }
 0x168   :  { %s269_s3 = vpop.sfrf %268 }
 0x169   :  { %p359_p3 = scmp.ne.s32.totalorder %s269_s3, 0 }
 0x16b   :  { %273 = shalt.err (%p359_p3)  }
 0x16c   :  { %275 = vsyncmov [#allocation3 + $0x9] }
 0x16f   :  { %s276_s13 = vpop.sfrf %275 }
 0x170   :  { %p360_p4 = scmp.ne.s32.totalorder %s276_s13, 0 }
 0x172   :  { %280 = shalt.err (%p360_p4)  }
 0x173   :  { %282 = vsyncmov [#allocation3 + $0xa] }
 0x176   :  { %s283_s14 = vpop.sfrf %282 }
 0x177   :  { %p361_p5 = scmp.ne.s32.totalorder %s283_s14, 0 }
 0x179   :  { %287 = shalt.err (%p361_p5)  }
 0x17a   :  { %289 = vsyncmov [#allocation3 + $0xb] }
 0x17d   :  { %s290_s15 = vpop.sfrf %289 }
 0x17e   :  { %p362_p6 = scmp.ne.s32.totalorder %s290_s15, 0 }
 0x180   :  { %294 = shalt.err (%p362_p6)  }
 0x181   :  { %296 = vsyncmov [#allocation3 + $0xc] }
 0x184   :  { %s297_s16 = vpop.sfrf %296 }
 0x185   :  { %p363_p7 = scmp.ne.s32.totalorder %s297_s16, 0 }
 0x187   :  { %301 = shalt.err (%p363_p7)  }
 0x188   :  { %303 = vsyncmov [#allocation3 + $0xd] }
 0x18b   :  { %s304_s17 = vpop.sfrf %303 }
 0x18c   :  { %p364_p8 = scmp.ne.s32.totalorder %s304_s17, 0 }
 0x18e   :  { %308 = shalt.err (%p364_p8)  }
 0x18f   :  { %310 = vsyncmov [#allocation3 + $0xe] }
 0x192   :  { %s311_s18 = vpop.sfrf %310 }
 0x193   :  { %p365_p9 = scmp.ne.s32.totalorder %s311_s18, 0 }
 0x195   :  { %315 = shalt.err (%p365_p9)  }
 0x196   :  { %317 = vsyncmov [#allocation3 + $0xf] }
 0x199   :  { %s318_s19 = vpop.sfrf %317 }
 0x19a   :  { %p366_p10 = scmp.ne.s32.totalorder %s318_s19, 0 }
 0x19c   :  { %322 = shalt.err (%p366_p10)  }

</bundles_post_ra>
